<compile_context>
chip_gen: v7x
topology: tpu7x:2x2x1
jax: 0.10.0
libtpu: 0.0.40
codegen_flags: <defaults>
</compile_context>

<pallas_src>
import functools

import jax
import jax.numpy as jnp
from jax.experimental import pallas as pl
from jax.experimental.pallas import tpu as pltpu


def _round_up(x, m):
    return -(-x // m) * m


# ---------------------------------------------------------------------------
# Kernel
# ---------------------------------------------------------------------------
def _nla_kernel(x_ref, diag_ref, w123_ref, b123_ref, wl_ref, bl_ref, out_ref,
                *, s_pad):
    """One grid step: one lane-dense tile of flattened (B*T) rows (columns)."""
    Sp = s_pad

    # Fused projection C -> 3*Sp: one wide MXU push, f32 accumulation.
    xw = jnp.dot(w123_ref[...], x_ref[...],
                 preferred_element_type=jnp.float32) + b123_ref[...]   # (3Sp, R)

    # 128-aligned sublane slices -> no relayout.
    x_a = xw[:Sp, :]
    x_b = jnp.tanh(xw[Sp:2 * Sp, :])
    x_c = xw[2 * Sp:, :]

    # einsum('bttn,btnh->bthn') with n_head == 1  ==  scale each row (column
    # here) by diag(wei).  diag_ref is (1, R) f32 and broadcasts over sublanes.
    gated = x_a * (x_b * x_c) * diag_ref[...]                          # (Sp, R)

    # Final projection Sp -> C, f32 accumulation; lane-dense store.
    y = jnp.dot(wl_ref[...], gated.astype(wl_ref.dtype),
                preferred_element_type=jnp.float32) + bl_ref[...]      # (C, R)
    out_ref[...] = y.astype(out_ref.dtype)


# ---------------------------------------------------------------------------
# Tiling / VMEM budgeting helpers
# ---------------------------------------------------------------------------
def _vmem_budget_bytes():
    """Per-step working-set budget derived from this chip's VMEM capacity."""
    try:
        cap = int(pltpu.get_tpu_info().vmem_capacity_bytes)
    except Exception:
        cap = 64 << 20          # assume the smallest part (v7x: 64 MiB / TC)
    # Quarter of physical VMEM, capped below the 32 MiB limit we request.
    return min(cap // 4, 24 << 20)


def _has_two_tensorcores():
    """Best-effort: v7x has 2 TensorCores per chip; v5e/v6e have 1.

    Only biases the tile split (perf, never correctness)."""
    try:
        kind = (jax.devices()[0].device_kind or "").lower()
    except Exception:
        return False
    return "v7" in kind


def _pick_block_rows(n_rows, *, c, s_pad, in_bytes, budget_bytes, two_tc):
    """Largest multiple-of-128 row tile that fits the VMEM budget."""
    c_sub = _round_up(c, 8)
    per_row = (
        2 * c_sub * in_bytes            # x tile, double-buffered
        + 2 * 8 * 4                     # diag tile (1, R) -> 8 sublanes, f32, x2
        + 2 * c_sub * 4                 # output tile (C, R) f32, double-buffered
        + (5 * s_pad + c_sub) * 4       # f32 intermediates: xw + bc + gated + y
        + s_pad * in_bytes              # compute_dtype copy of gated
    )
    rows = max(128, (budget_bytes // per_row) // 128 * 128)
    rows = min(rows, 2048)                       # past this, steps are cheap anyway
    rows = min(rows, _round_up(n_rows, 128))     # don't over-pad tiny inputs
    if two_tc and n_rows >= 256:
        # Prefer >= 2 grid steps so both v7x TensorCores get work.
        rows = min(rows, _round_up(-(-n_rows // 2), 128))
    return rows


# ---------------------------------------------------------------------------
# Parameter preparation (hoisted out of the per-call hot path)
# ---------------------------------------------------------------------------
def prepare_params(params, compute_dtype=jnp.bfloat16):
    """Fuse linear_1/2/3, pad each segment to a multiple of 128 output rows,
    transpose into the rows-on-lanes layout and cast matmul operands once."""
    w1, b1, w2, b2, w3, b3, wl, bl = params
    _, S = w1.shape
    Sp = _round_up(S, 128)

    def pad_w(w):                       # (C, S) -> (C, Sp) with zero columns
        return jnp.pad(w, ((0, 0), (0, Sp - S)))

    def pad_b(b):                       # (1, S) -> (1, Sp) with zero bias
        return jnp.pad(b, ((0, 0), (0, Sp - S)))

    w123_t = jnp.concatenate([pad_w(w1), pad_w(w2), pad_w(w3)], axis=1).T  # (3Sp, C)
    b123_c = jnp.concatenate([pad_b(b1), pad_b(b2), pad_b(b3)], axis=1).T  # (3Sp, 1)
    wl_t = jnp.pad(wl, ((0, Sp - S), (0, 0))).T                            # (C, Sp)
    bl_c = bl.T                                                            # (C, 1)
    return (w123_t.astype(compute_dtype),
            b123_c.astype(jnp.float32),
            wl_t.astype(compute_dtype),
            bl_c.astype(jnp.float32))


# ---------------------------------------------------------------------------
# Wrapper
# ---------------------------------------------------------------------------
@jax.jit
def non_linear_attention(x, wei, prepared):
    """x: (B, T, C), wei: (B, T, T), prepared: prepare_params(...). -> (B, T, C)."""
    B, T, C = x.shape
    w123_t, b123_c, wl_t, bl_c = prepared
    Sp = wl_t.shape[1]
    compute_dtype = w123_t.dtype

    n_rows = B * T
    # Rows-on-lanes layout (layout plumbing only; done by XLA in the wrapper).
    x_t = x.reshape(n_rows, C).T.astype(compute_dtype)                   # (C, N)
    diag = jnp.diagonal(wei, axis1=1, axis2=2).reshape(1, n_rows)        # (1, N)
    diag = diag.astype(jnp.float32)

    block_rows = _pick_block_rows(
        n_rows, c=C, s_pad=Sp,
        in_bytes=jnp.dtype(compute_dtype).itemsize,
        budget_bytes=_vmem_budget_bytes(),
        two_tc=_has_two_tensorcores())
    n_pad = _round_up(n_rows, block_rows)
    if n_pad != n_rows:
        x_t = jnp.pad(x_t, ((0, 0), (0, n_pad - n_rows)))
        diag = jnp.pad(diag, ((0, 0), (0, n_pad - n_rows)))
    grid = (n_pad // block_rows,)

    const = lambda shape: pl.BlockSpec(shape, lambda i: (0,) * len(shape))
    # NOTE: the four constant weight/bias blocks total < 200 KiB, so their
    # default double-buffering is negligible against the VMEM budget
    # (headroom verified, per review's escape clause for pl.Buffered(1)).
    out = pl.pallas_call(
        functools.partial(_nla_kernel, s_pad=Sp),
        out_shape=jax.ShapeDtypeStruct((C, n_pad), jnp.float32),
        grid_spec=pltpu.PrefetchScalarGridSpec(
            num_scalar_prefetch=0,
            grid=grid,
            in_specs=[
                pl.BlockSpec((C, block_rows), lambda i: (0, i)),   # x rows (lane-dense)
                pl.BlockSpec((1, block_rows), lambda i: (0, i)),   # diag(wei) (lane-dense)
                const((3 * Sp, C)), const((3 * Sp, 1)),            # fused linear_1/2/3
                const((C, Sp)), const((C, 1)),                     # last_linear
            ],
            out_specs=pl.BlockSpec((C, block_rows), lambda i: (0, i)),
        ),
        compiler_params=pltpu.CompilerParams(
            dimension_semantics=("parallel",),
            vmem_limit_bytes=32 * 1024 * 1024),
    )(x_t, diag, w123_t, b123_c, wl_t, bl_c)

    return out[:, :n_rows].T.reshape(B, T, C)


# ---------------------------------------------------------------------------
# Pure-JAX reference (literal mirror of the PyTorch forward) and params
# ---------------------------------------------------------------------------
def non_linear_attention_ref(x, wei, params, n_head=1):
    B, T, C = x.shape
    w1, b1, w2, b2, w3, b3, wl, bl = params
    S = w1.shape[1]
    x_a = x @ w1 + b1[0]
    x_b = jnp.tanh(x @ w2 + b2[0])
    x_c = x @ w3 + b3[0]
    x_bc = (x_b * x_c).reshape(B, T, n_head, S)
    wei4 = wei.reshape(B, T, T, n_head)
    # torch.einsum('bttn,btnh->bthn', wei4, x_bc): repeated 't' in operand 0
    # takes the diagonal wei4[b,t,t,n]; 't' is kept in the output, so there
    # is NO reduction -> out[b,t,h,n] = wei4[b,t,t,n] * x_bc[b,t,n,h].
    eye = jnp.eye(T, dtype=wei.dtype)
    diag = jnp.sum(wei4 * eye[None, :, :, None], axis=2)          # (B, T, n_head)
    out = diag[:, :, None, :] * jnp.swapaxes(x_bc, 2, 3)          # (B, T, S, n_head)
    out = out.reshape(B, T, -1)
    out = x_a * out
    return out @ wl + bl[0]


def init_params(key, n_embd):
    """Deterministic synthetic parameters (nn.Linear shapes, pre-transposed)."""
    S = 3 * n_embd // 4
    ks = jax.random.split(key, 8)

    def lin(kw, kb, fan_in, fan_out):
        bound = 1.0 / jnp.sqrt(fan_in)
        w = jax.random.uniform(kw, (fan_in, fan_out), jnp.float32, -bound, bound)
        b = jax.random.uniform(kb, (1, fan_out), jnp.float32, -bound, bound)
        return w, b

    w1, b1 = lin(ks[0], ks[1], n_embd, S)
    w2, b2 = lin(ks[2], ks[3], n_embd, S)
    w3, b3 = lin(ks[4], ks[5], n_embd, S)
    wl, bl = lin(ks[6], ks[7], S, n_embd)
    return (w1, b1, w2, b2, w3, b3, wl, bl)


if __name__ == "__main__":
    # Small config: n_embd=32 (linear_scale=24), n_head=1, batch=2, seq=8.
    B, T, C = 2, 8, 32
    key = jax.random.PRNGKey(0)
    k_x, k_w, k_p = jax.random.split(key, 3)

    x = jax.random.normal(k_x, (B, T, C), jnp.float32)
    wei = jax.random.normal(k_w, (B, T, T), jnp.float32)
    params = init_params(k_p, C)
    ref = non_linear_attention_ref(x, wei, params)

    # f32 matmul operands: tight semantic check of the kernel.
    out_f32 = non_linear_attention(x, wei, prepare_params(params, jnp.float32))
    out_f32 = jax.block_until_ready(out_f32)
    assert out_f32.shape == (B, T, C)
    assert jnp.allclose(out_f32, ref, atol=2e-3, rtol=2e-3), "f32 kernel mismatch"

    # bf16 matmul operands (recommended production default on v6e/v7x):
    # halves HBM read traffic; f32 accumulation kept, so only operand
    # quantization error remains (a semantic bug would be O(1)).
    out_bf16 = non_linear_attention(x, wei, prepare_params(params, jnp.bfloat16))
    out_bf16 = jax.block_until_ready(out_bf16)
    assert jnp.allclose(out_bf16, ref, atol=8e-2, rtol=8e-2), "bf16 kernel mismatch"

    print("KERNEL_OK")
</pallas_src>

<mosaic_0001>
module attributes {stable_mosaic.version = 11 : i64} {
  func.func @_nla_kernel(%arg0: i32, %arg1: memref<32x128xf32, #tpu.memory_space<vmem>>, %arg2: memref<1x128xf32, #tpu.memory_space<vmem>>, %arg3: memref<384x32xf32, #tpu.memory_space<vmem>>, %arg4: memref<384x1xf32, #tpu.memory_space<vmem>>, %arg5: memref<32x128xf32, #tpu.memory_space<vmem>>, %arg6: memref<32x1xf32, #tpu.memory_space<vmem>>, %arg7: memref<32x128xf32, #tpu.memory_space<vmem>>) attributes {dimension_semantics = [#tpu.dimension_semantics<parallel>], iteration_bounds = array<i64: 1>, scalar_prefetch = 0 : i64, scratch_operands = 0 : i64, tpu.core_type = #tpu.core_type<tc>, window_params = [{transform_indices = @transform_0, window_bounds = array<i64: 32, 128>}, {transform_indices = @transform_1, window_bounds = array<i64: 1, 128>}, {pipeline_mode = #tpu.pipeline_mode<synchronous>, transform_indices = @transform_2, window_bounds = array<i64: 384, 32>}, {pipeline_mode = #tpu.pipeline_mode<synchronous>, transform_indices = @transform_3, window_bounds = array<i64: 384, 1>}, {pipeline_mode = #tpu.pipeline_mode<synchronous>, transform_indices = @transform_4, window_bounds = array<i64: 32, 128>}, {pipeline_mode = #tpu.pipeline_mode<synchronous>, transform_indices = @transform_5, window_bounds = array<i64: 32, 1>}, {transform_indices = @transform_6, window_bounds = array<i64: 32, 128>}]} {
    %c0 = arith.constant 0 : index
    %c0_0 = arith.constant 0 : index
    %0 = vector.load %arg3[%c0, %c0_0] : memref<384x32xf32, #tpu.memory_space<vmem>>, vector<384x32xf32>
    %c0_1 = arith.constant 0 : index
    %c0_2 = arith.constant 0 : index
    %1 = vector.load %arg1[%c0_1, %c0_2] : memref<32x128xf32, #tpu.memory_space<vmem>>, vector<32x128xf32>
    %cst = arith.constant dense<0.000000e+00> : vector<384x128xf32>
    %2 = tpu.matmul %0, %1, %cst {dimension_numbers = #tpu.dot_dimension_numbers<[1], [0], [0], [1], [0, 0, 1, 1], [], []>} : vector<384x32xf32>, vector<32x128xf32>, vector<384x128xf32> -> vector<384x128xf32>
    %c0_3 = arith.constant 0 : index
    %c0_4 = arith.constant 0 : index
    %3 = vector.load %arg4[%c0_3, %c0_4] : memref<384x1xf32, #tpu.memory_space<vmem>>, vector<384x1xf32>
    %4 = vector.broadcast %3 : vector<384x1xf32> to vector<384x128xf32>
    %5 = arith.addf %2, %4 : vector<384x128xf32>
    %6 = vector.extract_strided_slice %5 {offsets = [0, 0], sizes = [128, 128], strides = [1, 1]} : vector<384x128xf32> to vector<128x128xf32>
    %7 = vector.extract_strided_slice %5 {offsets = [128, 0], sizes = [128, 128], strides = [1, 1]} : vector<384x128xf32> to vector<128x128xf32>
    %8 = math.tanh %7 : vector<128x128xf32>
    %9 = vector.extract_strided_slice %5 {offsets = [256, 0], sizes = [128, 128], strides = [1, 1]} : vector<384x128xf32> to vector<128x128xf32>
    %10 = arith.mulf %8, %9 : vector<128x128xf32>
    %11 = arith.mulf %6, %10 : vector<128x128xf32>
    %c0_5 = arith.constant 0 : index
    %c0_6 = arith.constant 0 : index
    %12 = vector.load %arg2[%c0_5, %c0_6] : memref<1x128xf32, #tpu.memory_space<vmem>>, vector<1x128xf32>
    %13 = vector.broadcast %12 : vector<1x128xf32> to vector<128x128xf32>
    %14 = arith.mulf %11, %13 : vector<128x128xf32>
    %c0_7 = arith.constant 0 : index
    %c0_8 = arith.constant 0 : index
    %15 = vector.load %arg5[%c0_7, %c0_8] : memref<32x128xf32, #tpu.memory_space<vmem>>, vector<32x128xf32>
    %cst_9 = arith.constant dense<0.000000e+00> : vector<32x128xf32>
    %16 = tpu.matmul %15, %14, %cst_9 {dimension_numbers = #tpu.dot_dimension_numbers<[1], [0], [0], [1], [0, 0, 1, 1], [], []>} : vector<32x128xf32>, vector<128x128xf32>, vector<32x128xf32> -> vector<32x128xf32>
    %c0_10 = arith.constant 0 : index
    %c0_11 = arith.constant 0 : index
    %17 = vector.load %arg6[%c0_10, %c0_11] : memref<32x1xf32, #tpu.memory_space<vmem>>, vector<32x1xf32>
    %18 = vector.broadcast %17 : vector<32x1xf32> to vector<32x128xf32>
    %19 = arith.addf %16, %18 : vector<32x128xf32>
    %c0_12 = arith.constant 0 : index
    %c0_13 = arith.constant 0 : index
    %20 = vector.load %arg7[%c0_12, %c0_13] : memref<32x128xf32, #tpu.memory_space<vmem>>, vector<32x128xf32>
    tpu.vector_store %arg7[%c0_12, %c0_13], %19 {strides = array<i32>} : memref<32x128xf32, #tpu.memory_space<vmem>>, vector<32x128xf32>,
    return
  }
  func.func @transform_0(%arg0: i32) -> (i32, i32) {
    %c0_i32 = arith.constant 0 : i32
    %c0_i32_0 = arith.constant 0 : i32
    return %c0_i32, %arg0 : i32, i32
  }
  func.func @transform_1(%arg0: i32) -> (i32, i32) {
    %c0_i32 = arith.constant 0 : i32
    %c0_i32_0 = arith.constant 0 : i32
    return %c0_i32, %arg0 : i32, i32
  }
  func.func @transform_2(%arg0: i32) -> (i32, i32) {
    %c0_i32 = arith.constant 0 : i32
    %c0_i32_0 = arith.constant 0 : i32
    %c0_i32_1 = arith.constant 0 : i32
    return %c0_i32, %c0_i32_0 : i32, i32
  }
  func.func @transform_3(%arg0: i32) -> (i32, i32) {
    %c0_i32 = arith.constant 0 : i32
    %c0_i32_0 = arith.constant 0 : i32
    %c0_i32_1 = arith.constant 0 : i32
    return %c0_i32, %c0_i32_0 : i32, i32
  }
  func.func @transform_4(%arg0: i32) -> (i32, i32) {
    %c0_i32 = arith.constant 0 : i32
    %c0_i32_0 = arith.constant 0 : i32
    %c0_i32_1 = arith.constant 0 : i32
    return %c0_i32, %c0_i32_0 : i32, i32
  }
  func.func @transform_5(%arg0: i32) -> (i32, i32) {
    %c0_i32 = arith.constant 0 : i32
    %c0_i32_0 = arith.constant 0 : i32
    %c0_i32_1 = arith.constant 0 : i32
    return %c0_i32, %c0_i32_0 : i32, i32
  }
  func.func @transform_6(%arg0: i32) -> (i32, i32) {
    %c0_i32 = arith.constant 0 : i32
    %c0_i32_0 = arith.constant 0 : i32
    return %c0_i32, %arg0 : i32, i32
  }
}

</mosaic_0001>

<bundles_post_ra>
// kernel: non_linear_attention.1
= control target key start
LH: loop header
LB: loop body
LE: loop exit
PB: predicated region body
PF: predicated region fallthrough
CT: control target
= control target key end

     0   :  { %v1323_v0 = vmov 0   ;;  %vm363_vm0 = vcmask 261120   ;;  %s1932_s3 = inlined_call_operand.vmem [shape: f32[384,1], index: 3, kind: input, shape index: {}]   ;;  %s1933_s0 = inlined_call_operand.vmem [shape: f32[32,128], index: 0, kind: input, shape index: {}]   ;;  %s1934_s2 = inlined_call_operand.vmem [shape: f32[384,32], index: 2, kind: input, shape index: {}]   ;;  %s1935_s5 = inlined_call_operand.vmem [shape: f32[32,1], index: 5, kind: input, shape index: {}]   ;;  %s1936_s4 = inlined_call_operand.vmem [shape: f32[32,128], index: 4, kind: input, shape index: {}]   ;;  %s1937_s1 = inlined_call_operand.vmem [shape: f32[1,128], index: 1, kind: input, shape index: {}]   ;;  %s1938_s6 = inlined_call_operand.vmem [shape: f32[32,128], index: 6, kind: output, shape index: {}]  }
   0x1   :  { %1290 = vset.pattern.permute.xlu1 %v1323_v0  ;;  %1289 = vset.pattern.permute.xlu0 %v1323_v0  ;;  %v93_v1 = vld [vmem:[%s1932_s3 + $0x90] sm:$0xff]  ;;  %v91_v2 = vld [vmem:[%s1932_s3 + $0x80] sm:$0xff]  ;;  %v72_v4 = vld [vmem:[%s1933_s0 + $0x8] sm:$0xff] }
   0x2   :  { %v71_v3 = vld [vmem:[%s1933_s0] sm:$0xff]  ;;  %215 = vperm.xlu1 %1290, %v93_v1   ;;  %205 = vperm.xlu0 %1289, %v91_v2   ;;  %v73_v6 = vld [vmem:[%s1933_s0 + $0x10] sm:$0xff]  ;;  %v74_v7 = vld [vmem:[%s1933_s0 + $0x18] sm:$0xff] }
   0x3   :  { %v1244_v5 = vpack.c.bf16 %v72_v4, %v71_v3  ;;  %v94_v8 = vld [vmem:[%s1932_s3 + $0x98] sm:$0xff]  ;;  %v92_v9 = vld [vmem:[%s1932_s3 + $0x88] sm:$0xff]  ;;  %v1248_v10 = vpack.c.bf16 %v74_v7, %v73_v6  ;;  %v23_v11 = vld [vmem:[%s1934_s2] sm:$0xff] }
   0x4   :  { %v49_v12 = vld [vmem:[%s1934_s2 + $0xd0] sm:$0xff]  ;;  %v96_v13 = vld [vmem:[%s1932_s3 + $0xa8] sm:$0xff]  ;;  %v95_v14 = vld [vmem:[%s1932_s3 + $0xa0] sm:$0xff]  ;;  %1134 = vmatprep.mubr.msk.f32.mxu0 %vm363_vm0, %v23_v11 }
   0x5   :  { %1245 = vmatprep.subr.bf16.mxu0 %v1244_v5  ;;  %1284 = vmatprep.subr.bf16.mxu1 %v1244_v5  ;;  %v24_v15 = vld [vmem:[%s1934_s2 + $0x8] sm:$0xff]  ;;  %v50_v16 = vld [vmem:[%s1934_s2 + $0xd8] sm:$0xff]  ;;  %v25_v17 = vld [vmem:[%s1934_s2 + $0x10] sm:$0xff] }
   0x6   :  { %1247 = vmatpush3.bf16.msra.mxu0 %v1244_v5  ;;  %1286 = vmatpush3.bf16.msra.mxu1 %v1244_v5  ;;  %v51_v18 = vld [vmem:[%s1934_s2 + $0xe0] sm:$0xff]  ;;  %v108_v19 = vld [vmem:[%s1932_s3 + $0x108] sm:$0xff]  ;;  %v26_v21 = vld [vmem:[%s1934_s2 + $0x18] sm:$0xff] }
   0x7   :  { %220 = vperm.xlu1 %1290, %v94_v8   ;;  %210 = vperm.xlu0 %1289, %v92_v9   ;;  %v107_v20 = vld [vmem:[%s1932_s3 + $0x100] sm:$0xff]  ;;  %v52_v22 = vld [vmem:[%s1934_s2 + $0xe8] sm:$0xff]  ;;  %v53_v24 = vld [vmem:[%s1934_s2 + $0xf0] sm:$0xff] }
   0x8   :  { %1249 = vmatprep.subr.bf16.mxu0 %v1248_v10  ;;  %1285 = vmatprep.subr.bf16.mxu1 %v1248_v10  ;;  %v27_v23 = vld [vmem:[%s1934_s2 + $0x20] sm:$0xff]  ;;  %v98_v25 = vld [vmem:[%s1932_s3 + $0xb8] sm:$0xff]  ;;  %v97_v26 = vld [vmem:[%s1932_s3 + $0xb0] sm:$0xff] }
   0x9   :  { %1173 = vmatprep.mubr.msk.f32.mxu1 %vm363_vm0, %v49_v12  ;;  %v28_v27 = vld [vmem:[%s1934_s2 + $0x28] sm:$0xff]  ;;  %v54_v28 = vld [vmem:[%s1934_s2 + $0xf8] sm:$0xff]  ;;  %v29_v29 = vld [vmem:[%s1934_s2 + $0x30] sm:$0xff] }
   0xa   :  { %1251 = vmatpush3.bf16.msra.mxu0 %v1248_v10  ;;  %1287 = vmatpush3.bf16.msra.mxu1 %v1248_v10  ;;  %v55_v30 = vld [vmem:[%s1934_s2 + $0x100] sm:$0xff]  ;;  %v76_v31 = vld [vmem:[%s1932_s3 + $0x8] sm:$0xff]  ;;  %v30_v33 = vld [vmem:[%s1934_s2 + $0x38] sm:$0xff] }
   0xb   :  { %230 = vperm.xlu1 %1290, %v96_v13   ;;  %225 = vperm.xlu0 %1289, %v95_v14   ;;  %v75_v32 = vld [vmem:[%s1932_s3] sm:$0xff]  ;;  %v56_v34 = vld [vmem:[%s1934_s2 + $0x108] sm:$0xff]  ;;  %v57_v36 = vld [vmem:[%s1934_s2 + $0x110] sm:$0xff] }
   0xc   :  { %v31_v35 = vld [vmem:[%s1934_s2 + $0x40] sm:$0xff]  ;;  %v110_v37 = vld [vmem:[%s1932_s3 + $0x118] sm:$0xff]  ;;  %v109_v38 = vld [vmem:[%s1932_s3 + $0x110] sm:$0xff] }
   0xd   :  { %1135 = vmatmul.mubr.msk.f32.vlgmr.msra.gmra.mrb[0].mxu0 %vm363_vm0, %v24_v15  ;;  %1174 = vmatmul.mubr.msk.f32.vlgmr.msra.gmra.mrb[0].mxu1 %vm363_vm0, %v50_v16  ;;  %v32_v39 = vld [vmem:[%s1934_s2 + $0x48] sm:$0xff]  ;;  %v58_v40 = vld [vmem:[%s1934_s2 + $0x118] sm:$0xff]  ;;  %v33_v41 = vld [vmem:[%s1934_s2 + $0x50] sm:$0xff] }
   0xe   :  { %1137 = vmatprep.mubr.msk.f32.mxu0 %vm363_vm0, %v25_v17  ;;  %1176 = vmatprep.mubr.msk.f32.mxu1 %vm363_vm0, %v51_v18  ;;  %v59_v42 = vld [vmem:[%s1934_s2 + $0x120] sm:$0xff]  ;;  %v100_v43 = vld [vmem:[%s1932_s3 + $0xc8] sm:$0xff]  ;;  %v34_v45 = vld [vmem:[%s1934_s2 + $0x58] sm:$0xff] }
   0xf   :  { %290 = vperm.xlu1 %1290, %v108_v19   ;;  %285 = vperm.xlu0 %1289, %v107_v20   ;;  %v99_v44 = vld [vmem:[%s1932_s3 + $0xc0] sm:$0xff]  ;;  %v60_v46 = vld [vmem:[%s1934_s2 + $0x128] sm:$0xff]  ;;  %v61_v48 = vld [vmem:[%s1934_s2 + $0x130] sm:$0xff] }
  0x10   :  { %v35_v47 = vld [vmem:[%s1934_s2 + $0x60] sm:$0xff]  ;;  %v78_v49 = vld [vmem:[%s1932_s3 + $0x18] sm:$0xff]  ;;  %v77_v50 = vld [vmem:[%s1932_s3 + $0x10] sm:$0xff] }
  0x11   :  { %1138 = vmatmul.mubr.msk.f32.gmra.mrb[2].mxu0 %vm363_vm0, %v26_v21  ;;  %1177 = vmatmul.mubr.msk.f32.gmra.mrb[2].mxu1 %vm363_vm0, %v52_v22  ;;  %v36_v51 = vld [vmem:[%s1934_s2 + $0x68] sm:$0xff]  ;;  %v62_v52 = vld [vmem:[%s1934_s2 + $0x138] sm:$0xff]  ;;  %v37_v53 = vld [vmem:[%s1934_s2 + $0x70] sm:$0xff] }
  0x12   :  { %1140 = vmatprep.mubr.msk.f32.mxu0 %vm363_vm0, %v27_v23  ;;  %1179 = vmatprep.mubr.msk.f32.mxu1 %vm363_vm0, %v53_v24  ;;  %v63_v54 = vld [vmem:[%s1934_s2 + $0x140] sm:$0xff]  ;;  %v112_v55 = vld [vmem:[%s1932_s3 + $0x128] sm:$0xff]  ;;  %v38_v57 = vld [vmem:[%s1934_s2 + $0x78] sm:$0xff] }
  0x13   :  { %240 = vperm.xlu1 %1290, %v98_v25   ;;  %235 = vperm.xlu0 %1289, %v97_v26   ;;  %v111_v56 = vld [vmem:[%s1932_s3 + $0x120] sm:$0xff]  ;;  %v64_v58 = vld [vmem:[%s1934_s2 + $0x148] sm:$0xff]  ;;  %v65_v60 = vld [vmem:[%s1934_s2 + $0x150] sm:$0xff] }
  0x14   :  { %v39_v59 = vld [vmem:[%s1934_s2 + $0x80] sm:$0xff]  ;;  %v102_v61 = vld [vmem:[%s1932_s3 + $0xd8] sm:$0xff]  ;;  %v101_v62 = vld [vmem:[%s1932_s3 + $0xd0] sm:$0xff] }
  0x15   :  { %1141 = vmatmul.mubr.msk.f32.gmra.mrb[4].mxu0 %vm363_vm0, %v28_v27  ;;  %1180 = vmatmul.mubr.msk.f32.gmra.mrb[4].mxu1 %vm363_vm0, %v54_v28  ;;  %v40_v63 = vld [vmem:[%s1934_s2 + $0x88] sm:$0xff]  ;;  %v66_v0 = vld [vmem:[%s1934_s2 + $0x158] sm:$0xff]  ;;  %v41_v1 = vld [vmem:[%s1934_s2 + $0x90] sm:$0xff] }
  0x16   :  { %1143 = vmatprep.mubr.msk.f32.mxu0 %vm363_vm0, %v29_v29  ;;  %1182 = vmatprep.mubr.msk.f32.mxu1 %vm363_vm0, %v55_v30  ;;  %v67_v2 = vld [vmem:[%s1934_s2 + $0x160] sm:$0xff]  ;;  %v80_v3 = vld [vmem:[%s1932_s3 + $0x28] sm:$0xff]  ;;  %v42_v5 = vld [vmem:[%s1934_s2 + $0x98] sm:$0xff] }
  0x17   :  { %130 = vperm.xlu1 %1290, %v76_v31   ;;  %125 = vperm.xlu0 %1289, %v75_v32   ;;  %v79_v4 = vld [vmem:[%s1932_s3 + $0x20] sm:$0xff]  ;;  %v68_v6 = vld [vmem:[%s1934_s2 + $0x168] sm:$0xff]  ;;  %v69_v8 = vld [vmem:[%s1934_s2 + $0x170] sm:$0xff] }
  0x18   :  { %v43_v7 = vld [vmem:[%s1934_s2 + $0xa0] sm:$0xff]  ;;  %v114_v9 = vld [vmem:[%s1932_s3 + $0x138] sm:$0xff]  ;;  %v113_v10 = vld [vmem:[%s1932_s3 + $0x130] sm:$0xff] }
  0x19   :  { %1144 = vmatmul.mubr.msk.f32.gmra.mrb[6].mxu0 %vm363_vm0, %v30_v33  ;;  %1183 = vmatmul.mubr.msk.f32.gmra.mrb[6].mxu1 %vm363_vm0, %v56_v34  ;;  %v44_v11 = vld [vmem:[%s1934_s2 + $0xa8] sm:$0xff]  ;;  %v70_v12 = vld [vmem:[%s1934_s2 + $0x178] sm:$0xff]  ;;  %v45_v13 = vld [vmem:[%s1934_s2 + $0xb0] sm:$0xff] }
  0x1a   :  { %1146 = vmatprep.mubr.msk.f32.mxu0 %vm363_vm0, %v31_v35  ;;  %1185 = vmatprep.mubr.msk.f32.mxu1 %vm363_vm0, %v57_v36  ;;  %v104_v14 = vld [vmem:[%s1932_s3 + $0xe8] sm:$0xff]  ;;  %v103_v15 = vld [vmem:[%s1932_s3 + $0xe0] sm:$0xff]  ;;  %v46_v16 = vld [vmem:[%s1934_s2 + $0xb8] sm:$0xff] }
  0x1b   :  { %300 = vperm.xlu1 %1290, %v110_v37   ;;  %295 = vperm.xlu0 %1289, %v109_v38   ;;  %v47_v17 = vld [vmem:[%s1934_s2 + $0xc0] sm:$0xff]  ;;  %v82_v18 = vld [vmem:[%s1932_s3 + $0x38] sm:$0xff]  ;;  %v81_v19 = vld [vmem:[%s1932_s3 + $0x30] sm:$0xff] }
  0x1c   :  { %v48_v20 = vld [vmem:[%s1934_s2 + $0xc8] sm:$0xff]  ;;  %v115_v22 = vld [vmem:[%s1932_s3 + $0x140] sm:$0xff]  ;;  %v106_v23 = vld [vmem:[%s1932_s3 + $0xf8] sm:$0xff] }
  0x1d   :  { %1147 = vmatmul.mubr.msk.f32.gmra.mrb[8].mxu0 %vm363_vm0, %v32_v39  ;;  %1186 = vmatmul.mubr.msk.f32.gmra.mrb[8].mxu1 %vm363_vm0, %v58_v40  ;;  %v116_v21 = vld [vmem:[%s1932_s3 + $0x148] sm:$0xff]  ;;  %v105_v24 = vld [vmem:[%s1932_s3 + $0xf0] sm:$0xff]  ;;  %v83_v26 = vld [vmem:[%s1932_s3 + $0x40] sm:$0xff] }
  0x1e   :  { %1149 = vmatprep.mubr.msk.f32.mxu0 %vm363_vm0, %v33_v41  ;;  %1188 = vmatprep.mubr.msk.f32.mxu1 %vm363_vm0, %v59_v42  ;;  %v84_v25 = vld [vmem:[%s1932_s3 + $0x48] sm:$0xff]  ;;  %v118_v27 = vld [vmem:[%s1932_s3 + $0x158] sm:$0xff]  ;;  %v117_v28 = vld [vmem:[%s1932_s3 + $0x150] sm:$0xff] }
  0x1f   :  { %250 = vperm.xlu1 %1290, %v100_v43   ;;  %245 = vperm.xlu0 %1289, %v99_v44   ;;  %v86_v29 = vld [vmem:[%s1932_s3 + $0x58] sm:$0xff]  ;;  %v85_v30 = vld [vmem:[%s1932_s3 + $0x50] sm:$0xff]  ;;  %v120_v31 = vld [vmem:[%s1932_s3 + $0x168] sm:$0xff] }
  0x20   :  { %v119_v32 = vld [vmem:[%s1932_s3 + $0x160] sm:$0xff]  ;;  %v88_v33 = vld [vmem:[%s1932_s3 + $0x68] sm:$0xff]  ;;  %v122_v35 = vld [vmem:[%s1932_s3 + $0x178] sm:$0xff] }
  0x21   :  { %1150 = vmatmul.mubr.msk.f32.gmra.mrb[10].mxu0 %vm363_vm0, %v34_v45  ;;  %1189 = vmatmul.mubr.msk.f32.gmra.mrb[10].mxu1 %vm363_vm0, %v60_v46  ;;  %v87_v34 = vld [vmem:[%s1932_s3 + $0x60] sm:$0xff]  ;;  %v121_v36 = vld [vmem:[%s1932_s3 + $0x170] sm:$0xff]  ;;  %v90_v37 = vld [vmem:[%s1932_s3 + $0x78] sm:$0xff] }
  0x22   :  { %1152 = vmatprep.mubr.msk.f32.mxu0 %vm363_vm0, %v35_v47  ;;  %1191 = vmatprep.mubr.msk.f32.mxu1 %vm363_vm0, %v61_v48  ;;  %v89_v38 = vld [vmem:[%s1932_s3 + $0x70] sm:$0xff]  ;;  %v889_v39 = vld [vmem:[%s1935_s5 + $0x8] sm:$0xff]  ;;  %v888_v40 = vld [vmem:[%s1935_s5] sm:$0xff] }
  0x23   :  { %140 = vperm.xlu1 %1290, %v78_v49   ;;  %135 = vperm.xlu0 %1289, %v77_v50   ;;  %v891_v41 = vld [vmem:[%s1935_s5 + $0x18] sm:$0xff]  ;;  %v890_v42 = vld [vmem:[%s1935_s5 + $0x10] sm:$0xff] }
  0x25   :  { %1153 = vmatmul.mubr.msk.f32.gmra.mrb[12].mxu0 %vm363_vm0, %v36_v51  ;;  %1192 = vmatmul.mubr.msk.f32.gmra.mrb[12].mxu1 %vm363_vm0, %v62_v52 }
  0x26   :  { %1155 = vmatprep.mubr.msk.f32.mxu0 %vm363_vm0, %v37_v53  ;;  %1194 = vmatprep.mubr.msk.f32.mxu1 %vm363_vm0, %v63_v54 }
  0x27   :  { %310 = vperm.xlu1 %1290, %v112_v55   ;;  %305 = vperm.xlu0 %1289, %v111_v56  }
  0x29   :  { %1156 = vmatmul.mubr.msk.f32.gmra.mrb[14].mxu0 %vm363_vm0, %v38_v57  ;;  %1195 = vmatmul.mubr.msk.f32.gmra.mrb[14].mxu1 %vm363_vm0, %v64_v58 }
  0x2a   :  { %1158 = vmatprep.mubr.msk.f32.mxu0 %vm363_vm0, %v39_v59  ;;  %1197 = vmatprep.mubr.msk.f32.mxu1 %vm363_vm0, %v65_v60 }
  0x2b   :  { %260 = vperm.xlu1 %1290, %v102_v61   ;;  %255 = vperm.xlu0 %1289, %v101_v62  }
  0x2d   :  { %1159 = vmatmul.mubr.msk.f32.gmra.mrb[16].mxu0 %vm363_vm0, %v40_v63  ;;  %1198 = vmatmul.mubr.msk.f32.gmra.mrb[16].mxu1 %vm363_vm0, %v66_v0 }
  0x2e   :  { %1161 = vmatprep.mubr.msk.f32.mxu0 %vm363_vm0, %v41_v1  ;;  %1200 = vmatprep.mubr.msk.f32.mxu1 %vm363_vm0, %v67_v2  ;;  %v884_v1 = vld [vmem:[%s1936_s4] sm:$0xff] }
  0x2f   :  { %150 = vperm.xlu1 %1290, %v80_v3   ;;  %145 = vperm.xlu0 %1289, %v79_v4  }
  0x31   :  { %1162 = vmatmul.mubr.msk.f32.gmra.mrb[18].mxu0 %vm363_vm0, %v42_v5  ;;  %1201 = vmatmul.mubr.msk.f32.gmra.mrb[18].mxu1 %vm363_vm0, %v68_v6 }
  0x32   :  { %1164 = vmatprep.mubr.msk.f32.mxu0 %vm363_vm0, %v43_v7  ;;  %1203 = vmatprep.mubr.msk.f32.mxu1 %vm363_vm0, %v69_v8 }
  0x33   :  { %320 = vperm.xlu1 %1290, %v114_v9   ;;  %315 = vperm.xlu0 %1289, %v113_v10  }
  0x35   :  { %1165 = vmatmul.mubr.msk.f32.gmra.mrb[20].mxu0 %vm363_vm0, %v44_v11  ;;  %1204 = vmatmul.mubr.msk.f32.gmra.mrb[20].mxu1 %vm363_vm0, %v70_v12 }
  0x36   :  { %1167 = vmatprep.mubr.msk.f32.mxu0 %vm363_vm0, %v45_v13  ;;  %1238 = vmatprep.mubr.f32.mxu1 %v884_v1 }
  0x37   :  { %270 = vperm.xlu1 %1290, %v104_v14   ;;  %265 = vperm.xlu0 %1289, %v103_v15  }
  0x39   :  { %1168 = vmatmul.mubr.msk.f32.gmra.mrb[22].mxu0 %vm363_vm0, %v46_v16 }
  0x3a   :  { %1170 = vmatprep.mubr.msk.f32.mxu0 %vm363_vm0, %v47_v17 }
  0x3b   :  { %160 = vperm.xlu1 %1290, %v82_v18   ;;  %155 = vperm.xlu0 %1289, %v81_v19  }
  0x3d   :  { %1171 = vmatmul.mubr.msk.f32.gmra.mrb[24].mxu0 %vm363_vm0, %v48_v20 }
  0x3f   :  { %330 = vperm.xlu1 %1290, %v116_v21   ;;  %325 = vperm.xlu0 %1289, %v115_v22  }
  0x43   :  { %280 = vperm.xlu1 %1290, %v106_v23   ;;  %275 = vperm.xlu0 %1289, %v105_v24  }
  0x47   :  { %170 = vperm.xlu1 %1290, %v84_v25   ;;  %165 = vperm.xlu0 %1289, %v83_v26  }
  0x4b   :  { %340 = vperm.xlu1 %1290, %v118_v27   ;;  %335 = vperm.xlu0 %1289, %v117_v28  }
  0x4f   :  { %180 = vperm.xlu1 %1290, %v86_v29   ;;  %175 = vperm.xlu0 %1289, %v85_v30  }
  0x53   :  { %350 = vperm.xlu1 %1290, %v120_v31   ;;  %345 = vperm.xlu0 %1289, %v119_v32  }
  0x57   :  { %190 = vperm.xlu1 %1290, %v88_v33   ;;  %185 = vperm.xlu0 %1289, %v87_v34  }
  0x5b   :  { %360 = vperm.xlu1 %1290, %v122_v35   ;;  %355 = vperm.xlu0 %1289, %v121_v36  }
  0x5f   :  { %200 = vperm.xlu1 %1290, %v90_v37   ;;  %195 = vperm.xlu0 %1289, %v89_v38  }
  0x63   :  { %899 = vperm.xlu1 %1290, %v889_v39   ;;  %894 = vperm.xlu0 %1289, %v888_v40  }
  0x67   :  { %909 = vperm.xlu1 %1290, %v891_v41   ;;  %904 = vperm.xlu0 %1289, %v890_v42  }
  0x81   :  { %v1719_v43 = vpop.permute.xlu1 %215  ;;  %v1721_v44 = vpop.permute.xlu0 %205 }
  0x86   :  { %v1723_v45 = vpop.permute.xlu1 %220  ;;  %v1725_v46 = vpop.permute.xlu0 %210 }
  0x8a   :  { %v1727_v47 = vpop.permute.xlu1 %230  ;;  %v1729_v48 = vpop.permute.xlu0 %225 }
  0x8e   :  { %v1731_v49 = vpop.permute.xlu1 %290  ;;  %v1733_v50 = vpop.permute.xlu0 %285 }
  0x92   :  { %v1735_v51 = vpop.permute.xlu1 %240  ;;  %v1737_v52 = vpop.permute.xlu0 %235 }
  0x96   :  { %v1739_v53 = vpop.permute.xlu1 %130  ;;  %v1741_v54 = vpop.permute.xlu0 %125 }
  0x9a   :  { %v1743_v55 = vpop.permute.xlu1 %300  ;;  %v1745_v56 = vpop.permute.xlu0 %295 }
  0x9e   :  { %v1747_v57 = vpop.permute.xlu1 %250  ;;  %v1749_v58 = vpop.permute.xlu0 %245 }
  0xa2   :  { %v1751_v59 = vpop.permute.xlu1 %140  ;;  %v1753_v60 = vpop.permute.xlu0 %135 }
  0xa6   :  { %v1755_v61 = vpop.permute.xlu1 %310  ;;  %v1757_v62 = vpop.permute.xlu0 %305 }
  0xaa   :  { %v261_v63 = vpop.permute.xlu1 %260  ;;  %v256_v0 = vpop.permute.xlu0 %255 }
  0xae   :  { %v1762_v2 = vpop.permute.xlu1 %150  ;;  %v1764_v3 = vpop.permute.xlu0 %145 }
  0xaf   :  { %1939 = vst [vmem:[#allocation2_spill] sm:$0xff] %v1764_v3 }
  0xb2   :  { %v1766_v4 = vpop.permute.xlu1 %320  ;;  %v1768_v5 = vpop.permute.xlu0 %315 }
  0xb3   :  { %1940 = vst [vmem:[#allocation3_spill] sm:$0xff] %v1766_v4  ;;  %1941 = vst [vmem:[#allocation4_spill] sm:$0xff] %v1768_v5 }
  0xb6   :  { %v271_v6 = vpop.permute.xlu1 %270  ;;  %v266_v7 = vpop.permute.xlu0 %265 }
  0xba   :  { %v1770_v8 = vpop.permute.xlu1 %160  ;;  %v1772_v9 = vpop.permute.xlu0 %155 }
  0xbb   :  { %1942 = vst [vmem:[#allocation5_spill] sm:$0xff] %v1770_v8  ;;  %1943 = vst [vmem:[#allocation6_spill] sm:$0xff] %v1772_v9 }
  0xbe   :  { %v1774_v10 = vpop.permute.xlu1 %330  ;;  %v1776_v11 = vpop.permute.xlu0 %325 }
  0xbf   :  { %1944 = vst [vmem:[#allocation7_spill] sm:$0xff] %v1774_v10  ;;  %1945 = vst [vmem:[#allocation8_spill] sm:$0xff] %v1776_v11 }
  0xc2   :  { %v281_v12 = vpop.permute.xlu1 %280  ;;  %v276_v13 = vpop.permute.xlu0 %275 }
  0xc6   :  { %v1778_v14 = vpop.permute.xlu1 %170  ;;  %v1780_v15 = vpop.permute.xlu0 %165 }
  0xc7   :  { %1946 = vst [vmem:[#allocation9_spill] sm:$0xff] %v1778_v14  ;;  %1947 = vst [vmem:[#allocation10_spill] sm:$0xff] %v1780_v15 }
  0xca   :  { %v341_v20 = vpop.permute.xlu1 %340  ;;  %v336_v21 = vpop.permute.xlu0 %335 }
  0xce   :  { %v181_v30 = vpop.permute.xlu1 %180  ;;  %v176_v31 = vpop.permute.xlu0 %175 }
  0xd2   :  { %v351_v40 = vpop.permute.xlu1 %350  ;;  %v346_v41 = vpop.permute.xlu0 %345 }
  0xd6   :  { %v191_v5 = vpop.permute.xlu1 %190  ;;  %v186_v4 = vpop.permute.xlu0 %185 }
  0xe0   :  { %v1782_v16 = vpop.f32.mrb[0].mxu0  ;;  %v1175_v17 = vpop.f32.mrb[0].mxu1 }
  0xe1   :  { %v1784_v18 = vpop.f32.mrb[1].mxu0  ;;  %v704_v19 = vpop.f32.mrb[1].mxu1  ;;  %v710_v42 = vadd.f32 %v1175_v17, %v261_v63 }
  0xe2   :  { %v705_v14 = vadd.f32 %v704_v19, %v256_v0 }
  0xe3   :  { %1291 = vtanh.f32 %v710_v42 }
  0xe4   :  { %v1786_v22 = vpop.f32.mrb[2].mxu0  ;;  %v1178_v23 = vpop.f32.mrb[2].mxu1  ;;  %1293 = vtanh.f32 %v705_v14 }
  0xe5   :  { %v1788_v24 = vpop.f32.mrb[3].mxu0  ;;  %v714_v25 = vpop.f32.mrb[3].mxu1 }
  0xe8   :  { %v1790_v26 = vpop.f32.mrb[4].mxu0  ;;  %v1181_v27 = vpop.f32.mrb[4].mxu1 }
  0xe9   :  { %v1792_v28 = vpop.f32.mrb[5].mxu0  ;;  %v724_v29 = vpop.f32.mrb[5].mxu1  ;;  %v730_v63 = vadd.f32 %v1181_v27, %v281_v12 }
  0xea   :  { %1948 = vst [vmem:[#allocation11_spill] sm:$0xff] %v1792_v28  ;;  %v725_v19 = vadd.f32 %v724_v29, %v276_v13  ;;  %v356_v13 = vpop.permute.xlu0 %355 }
  0xec   :  { %v1794_v32 = vpop.f32.mrb[6].mxu0  ;;  %v1796_v33 = vpop.f32.mrb[6].mxu1 }
  0xed   :  { %1949 = vst [vmem:[#allocation12_spill] sm:$0xff] %v1794_v32  ;;  %v1798_v34 = vpop.f32.mrb[7].mxu0  ;;  %v1800_v35 = vpop.f32.mrb[7].mxu1  ;;  %v715_v32 = vadd.f32 %v714_v25, %v266_v7 }
  0xee   :  { %1950 = vst [vmem:[#allocation13_spill] sm:$0xff] %v1798_v34  ;;  %v720_v34 = vadd.f32 %v1178_v23, %v271_v6  ;;  %v1292_v12 = vpop.eup %1291 }
  0xf0   :  { %v1802_v36 = vpop.f32.mrb[8].mxu0  ;;  %v1804_v37 = vpop.f32.mrb[8].mxu1  ;;  %1295 = vtanh.f32 %v720_v34 }
  0xf1   :  { %1951 = vst [vmem:[#allocation14_spill] sm:$0xff] %v1802_v36  ;;  %v1806_v38 = vpop.f32.mrb[9].mxu0  ;;  %v1808_v39 = vpop.f32.mrb[9].mxu1  ;;  %1297 = vtanh.f32 %v715_v32 }
  0xf2   :  { %1952 = vst [vmem:[#allocation15_spill] sm:$0xff] %v1806_v38  ;;  %1299 = vtanh.f32 %v730_v63  ;;  %v361_v32 = vpop.permute.xlu1 %360 }
  0xf3   :  { %1301 = vtanh.f32 %v725_v19 }
  0xf4   :  { %v1151_v1 = vpop.f32.mrb[10].mxu0  ;;  %v1810_v15 = vpop.f32.mrb[10].mxu1 }
  0xf5   :  { %v624_v11 = vpop.f32.mrb[11].mxu0  ;;  %v1812_v10 = vpop.f32.mrb[11].mxu1  ;;  %v630_v29 = vadd.f32 %v1151_v1, %v181_v30 }
  0xf8   :  { %v1154_v9 = vpop.f32.mrb[12].mxu0  ;;  %v1814_v36 = vpop.f32.mrb[12].mxu1 }
  0xf9   :  { %1953 = vst [vmem:[#allocation16_spill] sm:$0xff] %v1814_v36  ;;  %v634_v38 = vpop.f32.mrb[13].mxu0  ;;  %v1816_v8 = vpop.f32.mrb[13].mxu1 }
  0xfa   :  { %1954 = vst [vmem:[#allocation17_spill] sm:$0xff] %v1816_v8 }
  0xfc   :  { %v1818_v17 = vpop.f32.mrb[14].mxu0  ;;  %v1820_v0 = vpop.f32.mrb[14].mxu1 }
  0xfd   :  { %1955 = vst [vmem:[#allocation18_spill] sm:$0xff] %v1820_v0  ;;  %v1822_v42 = vpop.f32.mrb[15].mxu0  ;;  %v1824_v6 = vpop.f32.mrb[15].mxu1 }
  0xfe   :  { %1956 = vst [vmem:[#allocation19_spill] sm:$0xff] %v1824_v6  ;;  %v1294_v0 = vpop.eup %1293  ;;  %v625_v6 = vadd.f32 %v624_v11, %v176_v31 }
 0x100   :  { %v1160_v14 = vpop.f32.mrb[16].mxu0  ;;  %v1199_v7 = vpop.f32.mrb[16].mxu1 }
 0x101   :  { %v660_v23 = vadd.f32 %v1160_v14, %v1725_v46  ;;  %v790_v25 = vadd.f32 %v1199_v7, %v341_v20  ;;  %v654_v8 = vpop.f32.mrb[17].mxu0  ;;  %v784_v34 = vpop.f32.mrb[17].mxu1  ;;  %v1831_v46 = vld [vmem:[%s1937_s1] ss:$0 sm:$0xff] }
 0x102   :  { %v655_v27 = vadd.f32 %v654_v8, %v1721_v44  ;;  %v785_v36 = vadd.f32 %v784_v34, %v336_v21  ;;  %v1296_v7 = vpop.eup %1295 }
 0x103   :  { %1303 = vtanh.f32 %v660_v23  ;;  %v840_v28 = vmul.f32 %v1292_v12, %v790_v25  ;;  %v1298_v31 = vpop.eup %1297  ;;  %v635_v25 = vadd.f32 %v634_v38, %v186_v4 }
 0x104   :  { %1305 = vtanh.f32 %v655_v27  ;;  %v839_v63 = vmul.f32 %v1294_v0, %v785_v36  ;;  %v1163_v3 = vpop.f32.mrb[18].mxu0  ;;  %v1202_v19 = vpop.f32.mrb[18].mxu1  ;;  %v640_v36 = vadd.f32 %v1154_v9, %v191_v5 }
 0x105   :  { %v856_v20 = vmul.f32 %v840_v28, %v630_v29  ;;  %v670_v44 = vadd.f32 %v1163_v3, %v1723_v45  ;;  %v800_v8 = vadd.f32 %v1202_v19, %v351_v40  ;;  %v664_v21 = vpop.f32.mrb[19].mxu0  ;;  %v794_v14 = vpop.f32.mrb[19].mxu1  ;;  %v740_v3 = vadd.f32 %v1796_v33, %v1731_v49 }
 0x106   :  { %v855_v30 = vmul.f32 %v839_v63, %v625_v6  ;;  %v665_v1 = vadd.f32 %v664_v21, %v1719_v43  ;;  %v795_v11 = vadd.f32 %v794_v14, %v346_v41  ;;  %v1300_v9 = vpop.eup %1299  ;;  %v201_v27 = vpop.permute.xlu1 %200 }
 0x107   :  { %1307 = vtanh.f32 %v670_v44  ;;  %v842_v0 = vmul.f32 %v1296_v7, %v800_v8  ;;  %v879_v23 = vmul.f32 %v1831_v46, %v856_v20  ;;  %v1302_v19 = vpop.eup %1301  ;;  %v196_v20 = vpop.permute.xlu0 %195  ;;  %v650_v44 = vadd.f32 %v1818_v17, %v201_v27  ;;  %v1958_v27 = vld [vmem:[#allocation11_spill] sm:$0xff] }
 0x108   :  { %1309 = vtanh.f32 %v665_v1  ;;  %v841_v34 = vmul.f32 %v1298_v31, %v795_v11  ;;  %v1166_v28 = vpop.f32.mrb[20].mxu0  ;;  %v1205_v12 = vpop.f32.mrb[20].mxu1  ;;  %v878_v45 = vmul.f32 %v1831_v46, %v855_v30 }
 0x109   :  { %v858_v40 = vmul.f32 %v842_v0, %v640_v36  ;;  %v680_v43 = vadd.f32 %v1166_v28, %v1727_v47  ;;  %v810_v41 = vadd.f32 %v1205_v12, %v361_v32  ;;  %v674_v6 = vpop.f32.mrb[21].mxu0  ;;  %v804_v5 = vpop.f32.mrb[21].mxu1  ;;  %v645_v47 = vadd.f32 %v1822_v42, %v196_v20  ;;  %v1961_v20 = vld [vmem:[#allocation4_spill] sm:$0xff] }
 0x10a   :  { %v857_v29 = vmul.f32 %v841_v34, %v635_v25  ;;  %v675_v4 = vadd.f32 %v674_v6, %v1729_v48  ;;  %v805_v38 = vadd.f32 %v804_v5, %v356_v13  ;;  %v1841_v63 = vpack.c.bf16 %v879_v23, %v878_v45 }
 0x10b   :  { %1311 = vtanh.f32 %v680_v43  ;;  %v844_v49 = vmul.f32 %v1300_v9, %v810_v41  ;;  %v881_v33 = vmul.f32 %v1831_v46, %v858_v40  ;;  %v580_v48 = vadd.f32 %v1782_v16, %v1739_v53  ;;  %v1957_v9 = vld [vmem:[#allocation2_spill] sm:$0xff] }
 0x10c   :  { %1313 = vtanh.f32 %v675_v4  ;;  %v843_v32 = vmul.f32 %v1302_v19, %v805_v38  ;;  %v1169_v8 = vpop.f32.mrb[22].mxu0  ;;  %v880_v21 = vmul.f32 %v1831_v46, %v857_v29  ;;  %v735_v13 = vadd.f32 %v1800_v35, %v1733_v50  ;;  %v1959_v4 = vld [vmem:[#allocation3_spill] sm:$0xff]  ;;  %v1960_v38 = vld [vmem:[#allocation16_spill] sm:$0xff] }
 0x10d   :  { %v1304_v14 = vpop.eup %1303  ;;  %v860_v7 = vmul.f32 %v844_v49, %v650_v44  ;;  %v690_v17 = vadd.f32 %v1169_v8, %v1735_v51  ;;  %v684_v30 = vpop.f32.mrb[23].mxu0  ;;  %v575_v0 = vadd.f32 %v1784_v18, %v1741_v54  ;;  %v750_v50 = vadd.f32 %v1804_v37, %v1743_v55  ;;  %v1962_v44 = vld [vmem:[#allocation17_spill] sm:$0xff] }
 0x10e   :  { %v1306_v1 = vpop.eup %1305  ;;  %v859_v11 = vmul.f32 %v843_v32, %v645_v47  ;;  %v685_v42 = vadd.f32 %v684_v30, %v1737_v52  ;;  %v830_v31 = vmul.f32 %v1304_v14, %v740_v3  ;;  %v1853_v36 = vpack.c.bf16 %v881_v33, %v880_v21  ;;  %v1963_v47 = vld [vmem:[#allocation5_spill] sm:$0xff]  ;;  %v1964_v32 = vld [vmem:[#allocation12_spill] sm:$0xff] }
 0x10f   :  { %1315 = vtanh.f32 %v690_v17  ;;  %v829_v23 = vmul.f32 %v1306_v1, %v735_v13  ;;  %v883_v53 = vmul.f32 %v1831_v46, %v860_v7  ;;  %v590_v52 = vadd.f32 %v1786_v22, %v1751_v59  ;;  %v1966_v13 = vld [vmem:[#allocation13_spill] sm:$0xff]  ;;  %v1967_v1 = vld [vmem:[#allocation7_spill] sm:$0xff] }
 0x110   :  { %1317 = vtanh.f32 %v685_v42  ;;  %v1172_v51 = vpop.f32.mrb[24].mxu0  ;;  %v846_v16 = vmul.f32 %v830_v31, %v580_v48  ;;  %v882_v35 = vmul.f32 %v1831_v46, %v859_v11  ;;  %v745_v34 = vadd.f32 %v1808_v39, %v1745_v56  ;;  %v1965_v48 = vld [vmem:[#allocation6_spill] sm:$0xff] }
 0x111   :  { %v1308_v25 = vpop.eup %1307  ;;  %v700_v54 = vadd.f32 %v1172_v51, %v1747_v57  ;;  %v694_v18 = vpop.f32.mrb[25].mxu0  ;;  %v845_v28 = vmul.f32 %v829_v23, %v575_v0  ;;  %v585_v40 = vadd.f32 %v1788_v24, %v1753_v60  ;;  %v760_v56 = vadd.f32 %v1810_v15, %v1755_v61  ;;  %v1968_v11 = vld [vmem:[#allocation18_spill] sm:$0xff]  ;;  %v1969_v23 = vld [vmem:[#allocation8_spill] sm:$0xff] }
 0x112   :  { %v1310_v12 = vpop.eup %1309  ;;  %v695_v45 = vadd.f32 %v694_v18, %v1749_v58  ;;  %v869_v55 = vmul.f32 %v1831_v46, %v846_v16  ;;  %v832_v37 = vmul.f32 %v1308_v25, %v750_v50  ;;  %v1868_v3 = vpack.c.bf16 %v883_v53, %v882_v35  ;;  %v1970_v53 = vld [vmem:[#allocation19_spill] sm:$0xff]  ;;  %v1971_v25 = vld [vmem:[#allocation9_spill] sm:$0xff] }
 0x113   :  { %1319 = vtanh.f32 %v700_v54  ;;  %v868_v59 = vmul.f32 %v1831_v46, %v845_v28  ;;  %v831_v22 = vmul.f32 %v1310_v12, %v745_v34  ;;  %v755_v58 = vadd.f32 %v1812_v10, %v1757_v62  ;;  %v1973_v28 = vld [vmem:[#allocation10_spill] sm:$0xff]  ;;  %v1974_v12 = vld [vmem:[#allocation15_spill] sm:$0xff] }
 0x114   :  { %1321 = vtanh.f32 %v695_v45  ;;  %v848_v57 = vmul.f32 %v832_v37, %v590_v52  ;;  %v600_v5 = vadd.f32 %v1790_v26, %v1762_v2  ;;  %v595_v29 = vadd.f32 %v1958_v27, %v1957_v9  ;;  %v1972_v52 = vld [vmem:[#allocation14_spill] sm:$0xff] }
 0x115   :  { %v1312_v39 = vpop.eup %1311  ;;  %v1252_v43 = vpack.c.bf16 %v869_v55, %v868_v59  ;;  %v847_v41 = vmul.f32 %v831_v22, %v585_v40  ;;  %v770_v19 = vadd.f32 %v1960_v38, %v1959_v4  ;;  %v765_v49 = vadd.f32 %v1962_v44, %v1961_v20 }
 0x116   :  { %v1314_v6 = vpop.eup %1313  ;;  %v871_v60 = vmul.f32 %v1831_v46, %v848_v57  ;;  %v834_v24 = vmul.f32 %v1312_v39, %v760_v56  ;;  %v610_v8 = vadd.f32 %v1964_v32, %v1963_v47  ;;  %v605_v7 = vadd.f32 %v1966_v13, %v1965_v48 }
 0x117   :  { %1253 = vmatprep.subr.bf16.mxu1 %v1252_v43  ;;  %v870_v61 = vmul.f32 %v1831_v46, %v847_v41  ;;  %v833_v15 = vmul.f32 %v1314_v6, %v755_v58  ;;  %v780_v42 = vadd.f32 %v1968_v11, %v1967_v1  ;;  %v775_v50 = vadd.f32 %v1970_v53, %v1969_v23  ;;  %v886_v58 = vld [vmem:[%s1936_s4 + $0x10] sm:$0xff] }
 0x118   :  { %1255 = vmatpush3.bf16.msra.mxu1 %v1252_v43  ;;  %v850_v62 = vmul.f32 %v834_v24, %v600_v5  ;;  %v620_v34 = vadd.f32 %v1972_v52, %v1971_v25  ;;  %v615_v45 = vadd.f32 %v1974_v12, %v1973_v28  ;;  %v895_v43 = vpop.permute.xlu0 %894 }
 0x119   :  { %v1316_v10 = vpop.eup %1315  ;;  %v1256_v2 = vpack.c.bf16 %v871_v60, %v870_v61  ;;  %v849_v26 = vmul.f32 %v833_v15, %v595_v29 }
 0x11a   :  { %v1318_v33 = vpop.eup %1317  ;;  %v873_v21 = vmul.f32 %v1831_v46, %v850_v62  ;;  %v836_v14 = vmul.f32 %v1316_v10, %v770_v19 }
 0x11b   :  { %1257 = vmatprep.subr.bf16.mxu1 %v1256_v2  ;;  %v872_v17 = vmul.f32 %v1831_v46, %v849_v26  ;;  %v835_v30 = vmul.f32 %v1318_v33, %v765_v49 }
 0x11c   :  { %1259 = vmatpush3.bf16.msra.mxu1 %v1256_v2  ;;  %v852_v31 = vmul.f32 %v836_v14, %v610_v8  ;;  %v905_v9 = vpop.permute.xlu0 %904 }
 0x11d   :  { %v1320_v0 = vpop.eup %1319  ;;  %v1260_v51 = vpack.c.bf16 %v873_v21, %v872_v17  ;;  %v851_v16 = vmul.f32 %v835_v30, %v605_v7 }
 0x11e   :  { %v1322_v35 = vpop.eup %1321  ;;  %v875_v54 = vmul.f32 %v1831_v46, %v852_v31  ;;  %v838_v18 = vmul.f32 %v1320_v0, %v780_v42 }
 0x11f   :  { %1261 = vmatprep.subr.bf16.mxu1 %v1260_v51  ;;  %v874_v55 = vmul.f32 %v1831_v46, %v851_v16  ;;  %v837_v37 = vmul.f32 %v1322_v35, %v775_v50 }
 0x120   :  { %1263 = vmatpush3.bf16.msra.mxu1 %v1260_v51  ;;  %v854_v40 = vmul.f32 %v838_v18, %v620_v34 }
 0x121   :  { %v1264_v59 = vpack.c.bf16 %v875_v54, %v874_v55  ;;  %v853_v22 = vmul.f32 %v837_v37, %v615_v45 }
 0x122   :  { %v877_v56 = vmul.f32 %v1831_v46, %v854_v40 }
 0x123   :  { %1265 = vmatprep.subr.bf16.mxu1 %v1264_v59  ;;  %v876_v57 = vmul.f32 %v1831_v46, %v853_v22  ;;  %v885_v46 = vld [vmem:[%s1936_s4 + $0x8] sm:$0xff] }
 0x124   :  { %1267 = vmatpush3.bf16.msra.mxu1 %v1264_v59 }
 0x125   :  { %v1268_v39 = vpack.c.bf16 %v877_v56, %v876_v57 }
 0x127   :  { %1269 = vmatprep.subr.bf16.mxu1 %v1268_v39 }
 0x128   :  { %1271 = vmatpush3.bf16.msra.mxu1 %v1268_v39 }
 0x129   :  { %1273 = vmatprep.subr.bf16.mxu1 %v1841_v63 }
 0x12c   :  { %1275 = vmatpush3.bf16.msra.mxu1 %v1841_v63  ;;  %v887_v63 = vld [vmem:[%s1936_s4 + $0x18] sm:$0xff] }
 0x12d   :  { %1277 = vmatprep.subr.bf16.mxu1 %v1853_v36 }
 0x130   :  { %1279 = vmatpush3.bf16.msra.mxu1 %v1853_v36  ;;  %v900_v36 = vpop.permute.xlu1 %899 }
 0x131   :  { %1281 = vmatprep.subr.bf16.mxu1 %v1868_v3 }
 0x134   :  { %1283 = vmatpush3.bf16.msra.mxu1 %v1868_v3  ;;  %v910_v60 = vpop.permute.xlu1 %909 }
 0x137   :  { %1239 = vmatmul.mubr.f32.vlgmr.msra.gmra.mrb[22].mxu1 %v885_v46 }
 0x138   :  { %1241 = vmatprep.mubr.f32.mxu1 %v886_v58 }
 0x13b   :  { %1242 = vmatmul.mubr.f32.gmra.mrb[24].mxu1 %v887_v63 }
 0x20a   :  { %v1240_v41 = vpop.f32.mrb[22].mxu1 }
 0x20b   :  { %v984_v6 = vadd.f32 %v1240_v41, %v900_v36  ;;  %v978_v3 = vpop.f32.mrb[23].mxu1 }
 0x20c   :  { %v979_v5 = vadd.f32 %v978_v3, %v895_v43 }
 0x20d   :  { %998 = vst [vmem:[%s1938_s6 + $0x8] sm:$0xff] %v984_v6 }
 0x20e   :  { %997 = vst [vmem:[%s1938_s6] sm:$0xff] %v979_v5  ;;  %v1243_v24 = vpop.f32.mrb[24].mxu1 }
 0x20f   :  { %v994_v27 = vadd.f32 %v1243_v24, %v910_v60  ;;  %v988_v29 = vpop.f32.mrb[25].mxu1 }
 0x210   :  { %v989_v61 = vadd.f32 %v988_v29, %v905_v9 }
 0x211   :  { %1000 = vst [vmem:[%s1938_s6 + $0x18] sm:$0xff] %v994_v27 }
 0x212   :  { %999 = vst [vmem:[%s1938_s6 + $0x10] sm:$0xff] %v989_v61 }

</bundles_post_ra>
